<compile_context>
chip_gen: v5e
topology: v5e:2x2
jax: 0.10.0
libtpu: 0.0.40
codegen_flags: <defaults>
</compile_context>

<pallas_src>
import jax
import jax.numpy as jnp
from jax.experimental import pallas as pl
from jax.experimental.pallas import tpu as pltpu

_MiB = 1024 * 1024


# ---------------------------------------------------------------------------
# Primary copy path: single HBM -> HBM DMA (no VMEM staging, no vreg traffic).
# ---------------------------------------------------------------------------
def _dma_copy_kernel(x_hbm_ref, o_hbm_ref, sem):
    cp = pltpu.make_async_copy(x_hbm_ref, o_hbm_ref, sem)
    cp.start()
    cp.wait()


def pallas_dma_copy(x):
    """Materialized copy of `x` via one whole-array HBM->HBM DMA."""
    if x.ndim == 0 or x.size == 0:
        # Degenerate inputs: nothing worth a kernel launch.
        return x
    return pl.pallas_call(
        _dma_copy_kernel,
        out_shape=jax.ShapeDtypeStruct(x.shape, x.dtype),
        in_specs=[pl.BlockSpec(memory_space=pl.ANY)],
        out_specs=pl.BlockSpec(memory_space=pl.ANY),
        scratch_shapes=[pltpu.SemaphoreType.DMA],
    )(x)


# ---------------------------------------------------------------------------
# Secondary copy path: VMEM-staged, lane-dense, large-block tiled copy.
# ---------------------------------------------------------------------------
def _vmem_copy_kernel(x_ref, o_ref):
    # Pure tile copy: load the VMEM block and store it back out.
    o_ref[...] = x_ref[...]


def _vmem_budget_bytes():
    """(scratch budget, physical capacity) derived from the running chip."""
    try:
        cap = int(pltpu.get_tpu_info().vmem_capacity_bytes)
    except Exception:
        cap = 64 * _MiB  # conservative (v7x per-core size)
    budget = min(cap // 2, 48 * _MiB)
    return budget, cap


def pallas_vmem_copy(x):
    """Materialized copy of `x` via a lane-dense, large-block Pallas kernel."""
    if x.ndim == 0 or x.size == 0:
        return x

    orig_shape = x.shape
    dtype = x.dtype
    itemsize = jnp.dtype(dtype).itemsize
    total = int(x.size)

    # Sublane multiple: packed dtypes need 16 (bf16) / 32 (int8) rows per vreg.
    sub_mult = max(8, 32 // itemsize)

    # --- Lane-dense reshape: make the last dim a large multiple of 128 so
    # stores are full-lane (unmasked).  If the element count is not
    # 128-divisible, pad the flattened array instead of falling back to a
    # narrow (masked-store) last dim.
    lane = None
    for cand in (1024, 512, 256, 128):
        if total % cand == 0:
            lane = cand
            break
    if lane is None:
        lane = 512
        pad = (-total) % lane
    else:
        pad = 0

    x_flat = x.reshape(-1)
    if pad:
        x_flat = jnp.pad(x_flat, (0, pad))
    W = lane
    rows = (total + pad) // W
    x2d = x_flat.reshape(rows, W)

    # --- Block rows sized from the chip's VMEM capacity: in+out double
    # buffered = 4x block bytes, so block = budget/4 (~8 MiB v7x, ~12 MiB v6e).
    budget, vmem_cap = _vmem_budget_bytes()
    target_bytes = budget // 4
    row_bytes = W * itemsize
    cap_rows = max(sub_mult, (target_bytes // row_bytes) // sub_mult * sub_mult)

    # Megacore (v7x has 2 TCs): guarantee >=2 grid steps whenever rows permit.
    if rows >= 2 * sub_mult:
        half = max(sub_mult, (rows // 2) // sub_mult * sub_mult)
        cap_rows = min(cap_rows, half)

    block_rows = min(cap_rows, rows)
    if block_rows < rows:
        # Any partial block must still be (sub_mult,128)-aligned in shape.
        block_rows = max(sub_mult, (block_rows // sub_mult) * sub_mult)
    grid = (pl.cdiv(rows, block_rows),)  # partial tail block allowed

    vmem_limit = int(
        min(
            max(budget + 16 * _MiB, 4 * block_rows * row_bytes + 8 * _MiB),
            vmem_cap * 3 // 4,
        )
    )

    out2d = pl.pallas_call(
        _vmem_copy_kernel,
        out_shape=jax.ShapeDtypeStruct((rows, W), dtype),
        grid=grid,
        in_specs=[pl.BlockSpec((block_rows, W), lambda i: (i, 0))],
        out_specs=pl.BlockSpec((block_rows, W), lambda i: (i, 0)),
        compiler_params=pltpu.CompilerParams(
            dimension_semantics=("parallel",),
            vmem_limit_bytes=vmem_limit,
        ),
    )(x2d)

    out_flat = out2d.reshape(-1)
    if pad:
        out_flat = out_flat[:total]
    return out_flat.reshape(orig_shape)


class Test:
    """JAX/Pallas port of the PyTorch `Test` module."""

    def __init__(self):
        # cshogi.Board() initial state: black to move (turn == 0).
        self._board_turn = 0  # TODO(synk): cshogi.Board not representable in Pallas

    def forward(self, input_tensor):
        print(self._board_turn)  # mirrors `print(self.board.turn)` host-side
        # Identity forward: do not launch a kernel — zero HBM cost.
        return input_tensor

    __call__ = forward


if __name__ == "__main__":
    key = jax.random.PRNGKey(0)
    # Small NCHW input consistent with a generic 4D tensor: batch=2, C=4, 16x16.
    x = jax.random.normal(key, (2, 4, 16, 16), dtype=jnp.float32)

    model = Test()
    y = jax.block_until_ready(model(x))
    assert y.shape == x.shape and y.dtype == x.dtype
    assert bool(jnp.all(y == x))

    # Exercise the HBM->HBM DMA copy kernel (primary materialized-copy path).
    y_dma = jax.block_until_ready(pallas_dma_copy(x))
    assert y_dma.shape == x.shape and y_dma.dtype == x.dtype
    assert bool(jnp.all(y_dma == x))

    # Exercise the tuned VMEM-staged copy kernel as well.
    y_vmem = jax.block_until_ready(pallas_vmem_copy(x))
    assert y_vmem.shape == x.shape and y_vmem.dtype == x.dtype
    assert bool(jnp.all(y_vmem == x))

    print("KERNEL_OK")
</pallas_src>

<mosaic_0001>
module attributes {stable_mosaic.version = 11 : i64} {
  func.func @_dma_copy_kernel(%arg0: memref<2x4x16x16xf32, #tpu.memory_space<any>>, %arg1: memref<2x4x16x16xf32, #tpu.memory_space<any>>, %arg2: memref<!tpu.dma_semaphore, #tpu.memory_space<semaphore_mem>>) attributes {dimension_semantics = [], scalar_prefetch = 0 : i64, scratch_operands = 1 : i64, tpu.core_type = #tpu.core_type<tc>} {
    tpu.enqueue_dma source(%arg0 : memref<2x4x16x16xf32, #tpu.memory_space<any>>) target(%arg1 : memref<2x4x16x16xf32, #tpu.memory_space<any>>) target_semaphore(%arg2 : memref<!tpu.dma_semaphore, #tpu.memory_space<semaphore_mem>>)
    tpu.wait_dma2 semaphore(%arg2 : memref<!tpu.dma_semaphore, #tpu.memory_space<semaphore_mem>>) src(%arg0 : memref<2x4x16x16xf32, #tpu.memory_space<any>>) dst(%arg1 : memref<2x4x16x16xf32, #tpu.memory_space<any>>)
    return
  }
}

</mosaic_0001>

<bundles_post_ra>
// kernel: tpu_custom_call.1
= control target key start
LH: loop header
LB: loop body
LE: loop exit
PB: predicated region body
PF: predicated region fallthrough
CT: control target
= control target key end

     0   :  { %s34_s12 = smov [#allocation2]   ;;  %s35_s13 = smov [#allocation3]   ;;  %s53_s0 = inlined_call_operand.hbm [shape: f32[2,4,16,16], index: 0, kind: input, shape index: {}]   ;;  %s54_s1 = inlined_call_operand.hbm [shape: f32[2,4,16,16], index: 1, kind: output, shape index: {}]  }
   0x1   :  { %s10_s8 = sshll.u32 %s53_s0, 4  ;;  %s12_s11 = sshll.u32 %s54_s1, 4  ;;  %s11_s8 = int_to_ptr.hbm [resolvable:$true] %s10_s8  ;;  %s13_s11 = int_to_ptr.hbm [resolvable:$true] %s12_s11 }
   0x2   :  { %s36_s14 = smov 0  }
   0x3   :  { %16 = dma.general %s11_s8, 2048, %s13_s11, %s34_s12, %s35_s13, [#allocation4], %s36_s14, 0  }
   0x4   :  { %32 = dma.done.wait [#allocation2], 2048 }
   0x5   :  { %33 = vsyncadd [#allocation2], 4294965248 }
   0x6   :  { %22 = vsyncmov [#allocation2] }
   0x9   :  { %s23_s15 = vpop.sfrf %22 }
   0xa   :  { %p28_p0 = scmp.ne.s32.totalorder %s23_s15, 0 }
   0xc   :  { %27 = shalt.err (%p28_p0)  }

</bundles_post_ra>
